<compile_context>
chip_gen: v5e
topology: v5e:2x2
jax: 0.10.0
libtpu: 0.0.40
codegen_flags: <defaults>
</compile_context>

<pallas_src>
import jax
import jax.numpy as jnp
from jax.experimental import pallas as pl
from jax.experimental.pallas import tpu as pltpu

_SUBLANE = 8


def _round_up(x, m):
    return ((x + m - 1) // m) * m


def _langevin_mlp_kernel(x_ref, w1_ref, b1_ref, w2_ref, b2_ref, o_ref):
    # Optional low-precision compute: cast the x tile in VMEM to the weights' dtype
    # (no-op when everything is f32).
    x = x_ref[...].astype(w1_ref.dtype)
    # layer1: (TM, in) @ (in, H) on the MXU, f32 accumulation.
    h = jnp.dot(x, w1_ref[...], preferred_element_type=jnp.float32)
    # bias + ReLU stay in f32 (VPU); cast only at the second MXU boundary.
    h = jnp.maximum(h + b1_ref[...], 0.0)
    # layer2: (TM, H) @ (H, OUT) — narrow output, f32 accumulation.
    out = jnp.dot(h.astype(w2_ref.dtype), w2_ref[...],
                  preferred_element_type=jnp.float32)
    out = out + b2_ref[...]
    o_ref[...] = out.astype(o_ref.dtype)


def langevin_model_forward(x, w1, b1, w2, b2, input_dim, *,
                           tm=32768, compute_dtype=None):
    """Langevin_Model.forward as a single row-tiled Pallas kernel.

    x : any shape flattening to (-1, input_dim)   (mirrors x.view(-1, input_dim))
    w1: (input_dim, num_units),    b1: (num_units,)
    w2: (num_units, 2*output_dim), b2: (2*output_dim,)
    compute_dtype: e.g. jnp.bfloat16 — quantizes weights (wrapper) and the x tile
        (in-kernel, after DMA); accumulation stays f32. No HBM benefit, MXU-rate only.
    """
    x2d = jnp.reshape(x, (-1, input_dim))
    n = x2d.shape[0]
    num_units = w1.shape[1]
    out_dim2 = w2.shape[1]
    out_dtype = x2d.dtype

    # Weights are tiny and fetched once -> wrapper-side cast is fine. x stays f32 in HBM
    # (a wrapper cast would add a full extra read+write pass on a memory-bound kernel).
    if compute_dtype is not None:
        w1 = w1.astype(compute_dtype)
        w2 = w2.astype(compute_dtype)

    b1_2d = jnp.reshape(b1, (1, num_units)).astype(jnp.float32)
    b2_2d = jnp.reshape(b2, (1, out_dim2)).astype(jnp.float32)

    # Row tiling: large fixed TM amortizes per-step pipeline overhead; clamp for tiny
    # batches. No jnp.pad of x — Pallas clips the (read-only-garbage) last block and
    # masks the tail stores; rows are independent so this is safe.
    tm = min(tm, _round_up(n, _SUBLANE))
    tm = _round_up(tm, _SUBLANE)
    grid = (pl.cdiv(n, tm),)

    x_bytes = x2d.dtype.itemsize
    w_bytes = w1.dtype.itemsize
    cost = pl.CostEstimate(
        flops=2 * n * (input_dim * num_units + num_units * out_dim2),
        transcendentals=0,
        bytes_accessed=int(
            n * input_dim * x_bytes
            + n * out_dim2 * jnp.dtype(out_dtype).itemsize
            + (w1.size + w2.size) * w_bytes
            + (b1_2d.size + b2_2d.size) * 4),
    )

    out = pl.pallas_call(
        _langevin_mlp_kernel,
        out_shape=jax.ShapeDtypeStruct((n, out_dim2), out_dtype),
        grid_spec=pltpu.PrefetchScalarGridSpec(
            num_scalar_prefetch=0,
            grid=grid,
            in_specs=[
                # x: streamed row tiles (auto double-buffered pipeline).
                pl.BlockSpec((tm, input_dim), lambda i: (i, 0)),
                # weights / biases: constant block index -> VMEM-resident across tiles.
                pl.BlockSpec((input_dim, num_units), lambda i: (0, 0)),
                pl.BlockSpec((1, num_units), lambda i: (0, 0)),
                pl.BlockSpec((num_units, out_dim2), lambda i: (0, 0)),
                pl.BlockSpec((1, out_dim2), lambda i: (0, 0)),
            ],
            # Narrow output: last dim equals the full array dim (legal), so HBM
            # writeback carries only the real 2*output_dim columns.
            out_specs=pl.BlockSpec((tm, out_dim2), lambda i: (i, 0)),
        ),
        compiler_params=pltpu.CompilerParams(
            # Row tiles are independent -> allow v7x dual-TC sharding (no-op on v5e/v6e).
            dimension_semantics=("parallel",),
            vmem_limit_bytes=32 * 1024 * 1024,
        ),
        cost_estimate=cost,
    )(x2d, w1, b1_2d, w2, b2_2d)

    return out


def init_langevin_params(key, input_dim, output_dim, num_units, init_log_noise):
    """Deterministic init mirroring Langevin_Layer: uniform(-0.01, 0.01)."""
    k1, k2, k3, k4 = jax.random.split(key, 4)
    w1 = jax.random.uniform(k1, (input_dim, num_units), jnp.float32, -0.01, 0.01)
    b1 = jax.random.uniform(k2, (num_units,), jnp.float32, -0.01, 0.01)
    w2 = jax.random.uniform(k3, (num_units, 2 * output_dim), jnp.float32, -0.01, 0.01)
    b2 = jax.random.uniform(k4, (2 * output_dim,), jnp.float32, -0.01, 0.01)
    log_noise = jnp.array([init_log_noise], jnp.float32)  # not used in forward
    return w1, b1, w2, b2, log_noise


if __name__ == "__main__":
    input_dim = 16
    output_dim = 2
    num_units = 32
    batch = 8

    key = jax.random.PRNGKey(0)
    kx, kp = jax.random.split(key)
    x = jax.random.normal(kx, (batch, input_dim), jnp.float32)

    w1, b1, w2, b2, log_noise = init_langevin_params(
        kp, input_dim, output_dim, num_units, init_log_noise=-1.0)

    # f32 path (default) — tight correctness check against plain JAX reference.
    out = jax.block_until_ready(
        langevin_model_forward(x, w1, b1, w2, b2, input_dim))
    ref = jnp.maximum(jnp.reshape(x, (-1, input_dim)) @ w1 + b1, 0.0) @ w2 + b2
    assert out.shape == (batch, 2 * output_dim)
    assert jnp.allclose(out, ref, atol=1e-5, rtol=1e-5)

    # bf16-compute path (weights cast in wrapper, x tile cast in-kernel) — loose tolerance.
    out_bf16 = jax.block_until_ready(
        langevin_model_forward(x, w1, b1, w2, b2, input_dim,
                               compute_dtype=jnp.bfloat16))
    assert out_bf16.shape == (batch, 2 * output_dim)
    assert jnp.allclose(out_bf16, ref, atol=1e-2, rtol=1e-1)

    print("KERNEL_OK")
</pallas_src>

<mosaic_0001>
module attributes {stable_mosaic.version = 11 : i64} {
  func.func @_langevin_mlp_kernel(%arg0: i32, %arg1: memref<8x16xf32, #tpu.memory_space<vmem>>, %arg2: memref<16x32xf32, #tpu.memory_space<vmem>>, %arg3: memref<1x32xf32, #tpu.memory_space<vmem>>, %arg4: memref<32x4xf32, #tpu.memory_space<vmem>>, %arg5: memref<1x4xf32, #tpu.memory_space<vmem>>, %arg6: memref<8x4xf32, #tpu.memory_space<vmem>>) attributes {dimension_semantics = [#tpu.dimension_semantics<parallel>], iteration_bounds = array<i64: 1>, scalar_prefetch = 0 : i64, scratch_operands = 0 : i64, tpu.core_type = #tpu.core_type<tc>, window_params = [{transform_indices = @transform_0, window_bounds = array<i64: 8, 16>}, {pipeline_mode = #tpu.pipeline_mode<synchronous>, transform_indices = @transform_1, window_bounds = array<i64: 16, 32>}, {pipeline_mode = #tpu.pipeline_mode<synchronous>, transform_indices = @transform_2, window_bounds = array<i64: 1, 32>}, {pipeline_mode = #tpu.pipeline_mode<synchronous>, transform_indices = @transform_3, window_bounds = array<i64: 32, 4>}, {pipeline_mode = #tpu.pipeline_mode<synchronous>, transform_indices = @transform_4, window_bounds = array<i64: 1, 4>}, {transform_indices = @transform_5, window_bounds = array<i64: 8, 4>}]} {
    %c0 = arith.constant 0 : index
    %c0_0 = arith.constant 0 : index
    %0 = vector.load %arg1[%c0, %c0_0] : memref<8x16xf32, #tpu.memory_space<vmem>>, vector<8x16xf32>
    %c0_1 = arith.constant 0 : index
    %c0_2 = arith.constant 0 : index
    %1 = vector.load %arg2[%c0_1, %c0_2] : memref<16x32xf32, #tpu.memory_space<vmem>>, vector<16x32xf32>
    %cst = arith.constant dense<0.000000e+00> : vector<8x32xf32>
    %2 = tpu.matmul %0, %1, %cst {dimension_numbers = #tpu.dot_dimension_numbers<[1], [0], [0], [1], [0, 0, 1, 1], [], []>} : vector<8x16xf32>, vector<16x32xf32>, vector<8x32xf32> -> vector<8x32xf32>
    %c0_3 = arith.constant 0 : index
    %c0_4 = arith.constant 0 : index
    %3 = vector.load %arg3[%c0_3, %c0_4] : memref<1x32xf32, #tpu.memory_space<vmem>>, vector<1x32xf32>
    %4 = vector.broadcast %3 : vector<1x32xf32> to vector<8x32xf32>
    %5 = arith.addf %2, %4 : vector<8x32xf32>
    %cst_5 = arith.constant 0.000000e+00 : f32
    %6 = vector.broadcast %cst_5 : f32 to vector<8x32xf32>
    %7 = arith.maximumf %5, %6 : vector<8x32xf32>
    %c0_6 = arith.constant 0 : index
    %c0_7 = arith.constant 0 : index
    %8 = vector.load %arg4[%c0_6, %c0_7] : memref<32x4xf32, #tpu.memory_space<vmem>>, vector<32x4xf32>
    %cst_8 = arith.constant dense<0.000000e+00> : vector<8x4xf32>
    %9 = tpu.matmul %7, %8, %cst_8 {dimension_numbers = #tpu.dot_dimension_numbers<[1], [0], [0], [1], [0, 0, 1, 1], [], []>} : vector<8x32xf32>, vector<32x4xf32>, vector<8x4xf32> -> vector<8x4xf32>
    %c0_9 = arith.constant 0 : index
    %c0_10 = arith.constant 0 : index
    %10 = vector.load %arg5[%c0_9, %c0_10] : memref<1x4xf32, #tpu.memory_space<vmem>>, vector<1x4xf32>
    %11 = vector.broadcast %10 : vector<1x4xf32> to vector<8x4xf32>
    %12 = arith.addf %9, %11 : vector<8x4xf32>
    %c0_11 = arith.constant 0 : index
    %c0_12 = arith.constant 0 : index
    %13 = vector.load %arg6[%c0_11, %c0_12] : memref<8x4xf32, #tpu.memory_space<vmem>>, vector<8x4xf32>
    tpu.vector_store %arg6[%c0_11, %c0_12], %12 {strides = array<i32>} : memref<8x4xf32, #tpu.memory_space<vmem>>, vector<8x4xf32>,
    return
  }
  func.func @transform_0(%arg0: i32) -> (i32, i32) {
    %c0_i32 = arith.constant 0 : i32
    %c0_i32_0 = arith.constant 0 : i32
    return %arg0, %c0_i32 : i32, i32
  }
  func.func @transform_1(%arg0: i32) -> (i32, i32) {
    %c0_i32 = arith.constant 0 : i32
    %c0_i32_0 = arith.constant 0 : i32
    %c0_i32_1 = arith.constant 0 : i32
    return %c0_i32, %c0_i32_0 : i32, i32
  }
  func.func @transform_2(%arg0: i32) -> (i32, i32) {
    %c0_i32 = arith.constant 0 : i32
    %c0_i32_0 = arith.constant 0 : i32
    %c0_i32_1 = arith.constant 0 : i32
    return %c0_i32, %c0_i32_0 : i32, i32
  }
  func.func @transform_3(%arg0: i32) -> (i32, i32) {
    %c0_i32 = arith.constant 0 : i32
    %c0_i32_0 = arith.constant 0 : i32
    %c0_i32_1 = arith.constant 0 : i32
    return %c0_i32, %c0_i32_0 : i32, i32
  }
  func.func @transform_4(%arg0: i32) -> (i32, i32) {
    %c0_i32 = arith.constant 0 : i32
    %c0_i32_0 = arith.constant 0 : i32
    %c0_i32_1 = arith.constant 0 : i32
    return %c0_i32, %c0_i32_0 : i32, i32
  }
  func.func @transform_5(%arg0: i32) -> (i32, i32) {
    %c0_i32 = arith.constant 0 : i32
    %c0_i32_0 = arith.constant 0 : i32
    return %arg0, %c0_i32 : i32, i32
  }
}

</mosaic_0001>

<bundles_post_ra>
// kernel: tpu_custom_call.1
= control target key start
LH: loop header
LB: loop body
LE: loop exit
PB: predicated region body
PF: predicated region fallthrough
CT: control target
= control target key end

     0   :  { %vm27_vm0 = vcmask 130048   ;;  %vm60_vm1 = vcmask 261120   ;;  %vm84_vm2 = vcmask 31744   ;;  %s154_s1 = inlined_call_operand.vmem [shape: f32[16,32], index: 1, kind: input, shape index: {}]   ;;  %s155_s0 = inlined_call_operand.vmem [shape: f32[8,16], index: 0, kind: input, shape index: {}]   ;;  %s156_s3 = inlined_call_operand.vmem [shape: f32[32,4], index: 3, kind: input, shape index: {}]   ;;  %s157_s2 = inlined_call_operand.vmem [shape: f32[1,32], index: 2, kind: input, shape index: {}]   ;;  %s158_s4 = inlined_call_operand.vmem [shape: f32[1,4], index: 4, kind: input, shape index: {}]   ;;  %s159_s5 = inlined_call_operand.vmem [shape: f32[8,4], index: 5, kind: output, shape index: {}]  }
   0x1   :  { %v22_v0 = vld [vmem:[%s154_s1 + $0x8] sm:$0xff]  ;;  %v21_v1 = vld [vmem:[%s154_s1] sm:$0xff]  ;;  %v55_v3 = vld [vmem:[%s156_s3 + $0x18] sm:$0xff] }
   0x2   :  { %45 = vmatpush.msra.mxu0 %v22_v0  ;;  %v20_v2 = vld [vmem:[%s155_s0] sm:$0xff]  ;;  %76 = vmatpush.msra.mxu1 %v55_v3  ;;  %v54_v4 = vld [vmem:[%s156_s3 + $0x10] sm:$0xff]  ;;  %v53_v5 = vld [vmem:[%s156_s3 + $0x8] sm:$0xff] }
   0x3   :  { %v52_v6 = vld [vmem:[%s156_s3] sm:$0xff] }
   0x4   :  { %46 = vmatpush.msra.mxu0 %v21_v1  ;;  %77 = vmatpush.msra.mxu1 %v54_v4  ;;  %v92_v7 = vld [vmem:[%s157_s2] ss:$0 sm:$0xff] }
   0x5   :  { %90 = vmatmul.msk.f32.vlgmr.msra.gmra.mxu0 %vm27_vm0, %v20_v2  ;;  %v93_v11 = vld [vmem:[%s158_s4] ss:$0 sm:$0xff] }
   0x6   :  { %78 = vmatpush.msra.mxu1 %v53_v5 }
   0x8   :  { %79 = vmatpush.msra.mxu1 %v52_v6 }
  0x82   :  { %v48_v8 = vpop.f32.mrf.mxu0 }
  0x83   :  { %v49_v9 = vadd.f32 %v92_v7, %v48_v8 }
  0x85   :  { %v51_v10 = vmax.f32 %v49_v9, 0.0 }
  0x87   :  { %91 = vmatmul.msk.f32.vlgmr.msra.gmra.mxu1 %vm60_vm1, %v51_v10 }
 0x104   :  { %v81_v12 = vpop.f32.mrf.mxu1 }
 0x105   :  { %v82_v13 = vadd.f32 %v93_v11, %v81_v12 }
 0x107   :  { %85 = vst.msk [vmem:[%s159_s5] sm:$0xff] %vm84_vm2, %v82_v13 }

</bundles_post_ra>
